<compile_context>
chip_gen: v6e
topology: v6e:2x2x1
jax: 0.10.0
libtpu: 0.0.40
codegen_flags: <defaults>
</compile_context>

<pallas_src>
import jax
import jax.numpy as jnp
from jax.experimental import pallas as pl
from jax.experimental.pallas import tpu as pltpu

_LANES = 128


def _cdiv(a, b):
    return -(-a // b)


def _round_up(x, m):
    return ((x + m - 1) // m) * m


def _diou_kernel(n_ref, inp_ref, tgt_ref, out_ref):
    # n_ref:   (1,) int32 in SMEM  (true box count, scalar-prefetched)
    # inp_ref: (4, Tm, 128) f32 VMEM tile of predicted boxes (coord-major)
    # tgt_ref: (4, Tm, 128) f32 VMEM tile of target boxes
    # out_ref: (8, 128) f32 per-core partial-sum block (lane-dense accumulator)
    c = pl.program_id(0)
    i = pl.program_id(1)
    tiles_per_core = pl.num_programs(1)

    @pl.when(i == 0)
    def _():
        out_ref[...] = jnp.zeros_like(out_ref)

    uLp_x = inp_ref[0]
    uLp_y = inp_ref[1]
    lRp_x = inp_ref[2]
    lRp_y = inp_ref[3]
    uLt_x = tgt_ref[0]
    uLt_y = tgt_ref[1]
    lRt_x = tgt_ref[2]
    lRt_y = tgt_ref[3]

    # squared center distance (sqrt eliminated: value only ever used squared)
    dcx = (uLp_x + lRp_x - uLt_x - lRt_x) * 0.5
    dcy = (uLp_y + lRp_y - uLt_y - lRt_y) * 0.5
    p2 = dcx * dcx + dcy * dcy

    # squared diagonal of the enclosing box (sqrt eliminated)
    cw = jnp.maximum(lRt_x, lRp_x) - jnp.minimum(uLt_x, uLp_x)
    ch = jnp.maximum(lRt_y, lRp_y) - jnp.minimum(uLt_y, uLp_y)
    c2 = cw * cw + ch * ch

    # intersection: clamp form, identical to the where/gt/or form for valid boxes
    ix = jnp.maximum(jnp.minimum(lRt_x, lRp_x) - jnp.maximum(uLt_x, uLp_x), 0.0)
    iy = jnp.maximum(jnp.minimum(lRt_y, lRp_y) - jnp.maximum(uLt_y, uLp_y), 0.0)
    i_area = ix * iy

    rec_1 = (lRt_x - uLt_x) * (lRt_y - uLt_y)
    rec_2 = (lRp_x - uLp_x) * (lRp_y - uLp_y)
    total_area = rec_1 + rec_2 - i_area

    # one exact f32 divide shared by both ratio terms:
    #   i_area/total_area = i_area*c2*inv,  p2/c2 = p2*total_area*inv
    inv = 1.0 / (total_area * c2)
    diou = 1.0 - i_area * c2 * inv + p2 * total_area * inv

    tm, lanes = diou.shape
    n = n_ref[0]
    # global box index base of this tile; int32 (fine below ~2^31 total boxes)
    tile_idx = c * tiles_per_core + i
    tile_start = tile_idx * (tm * lanes)
    tile_end = tile_start + tm * lanes

    def accumulate(vals):
        # pure-VPU partial reduce: (Tm,128) -> (Tm/8, 8, 128) -> sum over vregs
        out_ref[...] += jnp.sum(vals.reshape(-1, 8, lanes), axis=0)

    @pl.when(tile_end <= n)
    def _():
        # tile is entirely real boxes: no mask work
        accumulate(diou)

    @pl.when(tile_end > n)
    def _():
        # tile reaches into the padding: select (NOT multiply) so padded
        # 0/0 = NaN lanes are dropped.
        row = jax.lax.broadcasted_iota(jnp.int32, (tm, lanes), 0)
        lane = jax.lax.broadcasted_iota(jnp.int32, (tm, lanes), 1)
        gidx = tile_start + row * lanes + lane
        accumulate(jnp.where(gidx < n, diou, 0.0))


def ciou_loss(inputs, targets, tile_rows=2048, split=2):
    """inputs, targets: (N, 4) boxes [uL_x, uL_y, lR_x, lR_y] -> scalar DIoU loss.

    N == 0 is undefined (division by zero), matching torch.mean of empty.
    """
    inputs = jnp.asarray(inputs, jnp.float32)
    targets = jnp.asarray(targets, jnp.float32)
    n = inputs.shape[0]

    m = _cdiv(n, _LANES)                              # sublane rows of 128 boxes
    tiles_per_core = max(1, _cdiv(m, split * tile_rows))
    num_tiles = split * tiles_per_core                # even split across cores
    tm = _round_up(_cdiv(m, num_tiles), 8)            # block rows (multiple of 8)
    m_pad = num_tiles * tm
    n_pad = m_pad * _LANES

    def pack(x):
        # single fused pad + transpose + reshape copy: (N, 4) -> (4, m_pad, 128)
        x = jnp.pad(x, ((0, n_pad - n), (0, 0)))
        return x.T.reshape(4, m_pad, _LANES)

    partials = pl.pallas_call(
        _diou_kernel,
        out_shape=jax.ShapeDtypeStruct((split * 8, _LANES), jnp.float32),
        grid_spec=pltpu.PrefetchScalarGridSpec(
            num_scalar_prefetch=1,
            grid=(split, tiles_per_core),
            in_specs=[
                pl.BlockSpec((4, tm, _LANES),
                             lambda c, i, n_s: (0, c * tiles_per_core + i, 0)),
                pl.BlockSpec((4, tm, _LANES),
                             lambda c, i, n_s: (0, c * tiles_per_core + i, 0)),
            ],
            out_specs=pl.BlockSpec((8, _LANES), lambda c, i, n_s: (c, 0)),
        ),
        compiler_params=pltpu.CompilerParams(
            dimension_semantics=("parallel", "arbitrary"),
            vmem_limit_bytes=48 * 1024 * 1024,
        ),
    )(jnp.array([n], jnp.int32), pack(inputs), pack(targets))

    # single cross-lane reduce + divide by true N, done once outside the kernel
    return jnp.sum(partials) / n


def _ciou_ref(inputs, targets):
    # pure-JAX reference mirroring the torch forward
    uLt, lRt = targets[:, 0:2], targets[:, 2:4]
    uLp, lRp = inputs[:, 0:2], inputs[:, 2:4]
    tcen = (uLt + lRt) / 2.0
    pcen = (uLp + lRp) / 2.0
    p = jnp.sqrt((pcen[:, 0] - tcen[:, 0]) ** 2 + (pcen[:, 1] - tcen[:, 1]) ** 2)
    bb_uL = jnp.minimum(uLt, uLp)
    bb_lR = jnp.maximum(lRt, lRp)
    C = jnp.sqrt((bb_lR[:, 0] - bb_uL[:, 0]) ** 2 + (bb_lR[:, 1] - bb_uL[:, 1]) ** 2)
    X = jnp.where((uLp[:, 0] > lRt[:, 0]) | (uLt[:, 0] > lRp[:, 0]), 0.0, 1.0) * (
        jnp.minimum(lRt[:, 0], lRp[:, 0]) - jnp.maximum(uLt[:, 0], uLp[:, 0]))
    Y = jnp.where((uLp[:, 1] > lRt[:, 1]) | (uLt[:, 1] > lRp[:, 1]), 0.0, 1.0) * (
        jnp.minimum(lRt[:, 1], lRp[:, 1]) - jnp.maximum(uLt[:, 1], uLp[:, 1]))
    i_area = X * Y
    rec_1 = (lRt[:, 0] - uLt[:, 0]) * (lRt[:, 1] - uLt[:, 1])
    rec_2 = (lRp[:, 0] - uLp[:, 0]) * (lRp[:, 1] - uLp[:, 1])
    IoU = i_area / (rec_1 + rec_2 - i_area)
    return jnp.mean(1.0 - IoU + p ** 2 / C ** 2)


def _make_boxes(key, n):
    k1, k2 = jax.random.split(key)
    uL = jax.random.uniform(k1, (n, 2), jnp.float32, 0.0, 8.0)
    wh = jax.random.uniform(k2, (n, 2), jnp.float32, 1.0, 6.0)
    return jnp.concatenate([uL, uL + wh], axis=1)  # valid boxes: uL < lR


if __name__ == "__main__":
    key = jax.random.PRNGKey(0)
    k_in, k_tg, k_in2, k_tg2 = jax.random.split(key, 4)

    # small case matching the module spec: (N, 4) boxes
    N = 8
    inputs = _make_boxes(k_in, N)
    targets = _make_boxes(k_tg, N)
    out = ciou_loss(inputs, targets)
    jax.block_until_ready(out)
    ref = _ciou_ref(inputs, targets)
    assert jnp.allclose(out, ref, rtol=1e-5, atol=1e-5), (out, ref)

    # multi-tile + partial-lane masking check (tiny tile -> several grid steps,
    # exercises both the unmasked interior path and the masked tail path)
    N2 = 2500
    inputs2 = _make_boxes(k_in2, N2)
    targets2 = _make_boxes(k_tg2, N2)
    out2 = ciou_loss(inputs2, targets2, tile_rows=8)
    jax.block_until_ready(out2)
    ref2 = _ciou_ref(inputs2, targets2)
    assert jnp.allclose(out2, ref2, rtol=1e-4, atol=1e-4), (out2, ref2)

    # default (large-tile) config on the bigger problem as well
    out3 = ciou_loss(inputs2, targets2)
    jax.block_until_ready(out3)
    assert jnp.allclose(out3, ref2, rtol=1e-4, atol=1e-4), (out3, ref2)

    print("KERNEL_OK")
</pallas_src>

<mosaic_0001>
module attributes {stable_mosaic.version = 11 : i64} {
  func.func @_diou_kernel(%arg0: i32, %arg1: i32, %arg2: memref<1xi32, #tpu.memory_space<smem>>, %arg3: memref<4x8x128xf32, #tpu.memory_space<vmem>>, %arg4: memref<4x8x128xf32, #tpu.memory_space<vmem>>, %arg5: memref<8x128xf32, #tpu.memory_space<vmem>>) attributes {dimension_semantics = [#tpu.dimension_semantics<parallel>, #tpu.dimension_semantics<arbitrary>], iteration_bounds = array<i64: 2, 1>, scalar_prefetch = 1 : i64, scratch_operands = 0 : i64, tpu.core_type = #tpu.core_type<tc>, window_params = [{transform_indices = @transform_0, window_bounds = array<i64: 4, 8, 128>}, {transform_indices = @transform_1, window_bounds = array<i64: 4, 8, 128>}, {transform_indices = @transform_2, window_bounds = array<i64: 8, 128>}]} {
    %c0_i32 = arith.constant 0 : i32
    %0 = arith.cmpi eq, %arg1, %c0_i32 : i32
    %1 = arith.extui %0 : i1 to i32
    %c0_i32_0 = arith.constant 0 : i32
    %2 = arith.cmpi ne, %1, %c0_i32_0 : i32
    scf.if %2 {
      %cst_30 = arith.constant 0.000000e+00 : f32
      %81 = vector.broadcast %cst_30 : f32 to vector<8x128xf32>
      %c0_31 = arith.constant 0 : index
      %c0_32 = arith.constant 0 : index
      %82 = vector.load %arg5[%c0_31, %c0_32] : memref<8x128xf32, #tpu.memory_space<vmem>>, vector<8x128xf32>
      tpu.vector_store %arg5[%c0_31, %c0_32], %81 {strides = array<i32>} : memref<8x128xf32, #tpu.memory_space<vmem>>, vector<8x128xf32>,
    } else {
    }
    %c0 = arith.constant 0 : index
    %c0_1 = arith.constant 0 : index
    %c0_2 = arith.constant 0 : index
    %3 = vector.load %arg3[%c0, %c0_1, %c0_2] : memref<4x8x128xf32, #tpu.memory_space<vmem>>, vector<1x8x128xf32>
    %4 = vector.shape_cast %3 : vector<1x8x128xf32> to vector<8x128xf32>
    %c1 = arith.constant 1 : index
    %c0_3 = arith.constant 0 : index
    %c0_4 = arith.constant 0 : index
    %5 = vector.load %arg3[%c1, %c0_3, %c0_4] : memref<4x8x128xf32, #tpu.memory_space<vmem>>, vector<1x8x128xf32>
    %6 = vector.shape_cast %5 : vector<1x8x128xf32> to vector<8x128xf32>
    %c2 = arith.constant 2 : index
    %c0_5 = arith.constant 0 : index
    %c0_6 = arith.constant 0 : index
    %7 = vector.load %arg3[%c2, %c0_5, %c0_6] : memref<4x8x128xf32, #tpu.memory_space<vmem>>, vector<1x8x128xf32>
    %8 = vector.shape_cast %7 : vector<1x8x128xf32> to vector<8x128xf32>
    %c3 = arith.constant 3 : index
    %c0_7 = arith.constant 0 : index
    %c0_8 = arith.constant 0 : index
    %9 = vector.load %arg3[%c3, %c0_7, %c0_8] : memref<4x8x128xf32, #tpu.memory_space<vmem>>, vector<1x8x128xf32>
    %10 = vector.shape_cast %9 : vector<1x8x128xf32> to vector<8x128xf32>
    %c0_9 = arith.constant 0 : index
    %c0_10 = arith.constant 0 : index
    %c0_11 = arith.constant 0 : index
    %11 = vector.load %arg4[%c0_9, %c0_10, %c0_11] : memref<4x8x128xf32, #tpu.memory_space<vmem>>, vector<1x8x128xf32>
    %12 = vector.shape_cast %11 : vector<1x8x128xf32> to vector<8x128xf32>
    %c1_12 = arith.constant 1 : index
    %c0_13 = arith.constant 0 : index
    %c0_14 = arith.constant 0 : index
    %13 = vector.load %arg4[%c1_12, %c0_13, %c0_14] : memref<4x8x128xf32, #tpu.memory_space<vmem>>, vector<1x8x128xf32>
    %14 = vector.shape_cast %13 : vector<1x8x128xf32> to vector<8x128xf32>
    %c2_15 = arith.constant 2 : index
    %c0_16 = arith.constant 0 : index
    %c0_17 = arith.constant 0 : index
    %15 = vector.load %arg4[%c2_15, %c0_16, %c0_17] : memref<4x8x128xf32, #tpu.memory_space<vmem>>, vector<1x8x128xf32>
    %16 = vector.shape_cast %15 : vector<1x8x128xf32> to vector<8x128xf32>
    %c3_18 = arith.constant 3 : index
    %c0_19 = arith.constant 0 : index
    %c0_20 = arith.constant 0 : index
    %17 = vector.load %arg4[%c3_18, %c0_19, %c0_20] : memref<4x8x128xf32, #tpu.memory_space<vmem>>, vector<1x8x128xf32>
    %18 = vector.shape_cast %17 : vector<1x8x128xf32> to vector<8x128xf32>
    %19 = arith.addf %4, %8 : vector<8x128xf32>
    %20 = arith.subf %19, %12 : vector<8x128xf32>
    %21 = arith.subf %20, %16 : vector<8x128xf32>
    %cst = arith.constant 5.000000e-01 : f32
    %22 = vector.broadcast %cst : f32 to vector<8x128xf32>
    %23 = arith.mulf %21, %22 : vector<8x128xf32>
    %24 = arith.addf %6, %10 : vector<8x128xf32>
    %25 = arith.subf %24, %14 : vector<8x128xf32>
    %26 = arith.subf %25, %18 : vector<8x128xf32>
    %cst_21 = arith.constant 5.000000e-01 : f32
    %27 = vector.broadcast %cst_21 : f32 to vector<8x128xf32>
    %28 = arith.mulf %26, %27 : vector<8x128xf32>
    %29 = arith.mulf %23, %23 : vector<8x128xf32>
    %30 = arith.mulf %28, %28 : vector<8x128xf32>
    %31 = arith.addf %29, %30 : vector<8x128xf32>
    %32 = arith.maximumf %16, %8 : vector<8x128xf32>
    %33 = arith.minimumf %12, %4 : vector<8x128xf32>
    %34 = arith.subf %32, %33 : vector<8x128xf32>
    %35 = arith.maximumf %18, %10 : vector<8x128xf32>
    %36 = arith.minimumf %14, %6 : vector<8x128xf32>
    %37 = arith.subf %35, %36 : vector<8x128xf32>
    %38 = arith.mulf %34, %34 : vector<8x128xf32>
    %39 = arith.mulf %37, %37 : vector<8x128xf32>
    %40 = arith.addf %38, %39 : vector<8x128xf32>
    %41 = arith.minimumf %16, %8 : vector<8x128xf32>
    %42 = arith.maximumf %12, %4 : vector<8x128xf32>
    %43 = arith.subf %41, %42 : vector<8x128xf32>
    %cst_22 = arith.constant 0.000000e+00 : f32
    %44 = vector.broadcast %cst_22 : f32 to vector<8x128xf32>
    %45 = arith.maximumf %43, %44 : vector<8x128xf32>
    %46 = arith.minimumf %18, %10 : vector<8x128xf32>
    %47 = arith.maximumf %14, %6 : vector<8x128xf32>
    %48 = arith.subf %46, %47 : vector<8x128xf32>
    %cst_23 = arith.constant 0.000000e+00 : f32
    %49 = vector.broadcast %cst_23 : f32 to vector<8x128xf32>
    %50 = arith.maximumf %48, %49 : vector<8x128xf32>
    %51 = arith.mulf %45, %50 : vector<8x128xf32>
    %52 = arith.subf %16, %12 : vector<8x128xf32>
    %53 = arith.subf %18, %14 : vector<8x128xf32>
    %54 = arith.mulf %52, %53 : vector<8x128xf32>
    %55 = arith.subf %8, %4 : vector<8x128xf32>
    %56 = arith.subf %10, %6 : vector<8x128xf32>
    %57 = arith.mulf %55, %56 : vector<8x128xf32>
    %58 = arith.addf %54, %57 : vector<8x128xf32>
    %59 = arith.subf %58, %51 : vector<8x128xf32>
    %60 = arith.mulf %59, %40 : vector<8x128xf32>
    %cst_24 = arith.constant 1.000000e+00 : f32
    %61 = vector.broadcast %cst_24 : f32 to vector<8x128xf32>
    %62 = arith.divf %61, %60 : vector<8x128xf32>
    %63 = arith.mulf %51, %40 : vector<8x128xf32>
    %64 = arith.mulf %63, %62 : vector<8x128xf32>
    %cst_25 = arith.constant 1.000000e+00 : f32
    %65 = vector.broadcast %cst_25 : f32 to vector<8x128xf32>
    %66 = arith.subf %65, %64 : vector<8x128xf32>
    %67 = arith.mulf %31, %59 : vector<8x128xf32>
    %68 = arith.mulf %67, %62 : vector<8x128xf32>
    %69 = arith.addf %66, %68 : vector<8x128xf32>
    %c0_26 = arith.constant 0 : index
    %70 = memref.load %arg2[%c0_26] : memref<1xi32, #tpu.memory_space<smem>>
    %c1_i32 = arith.constant 1 : i32
    %71 = arith.muli %arg0, %c1_i32 : i32
    %72 = arith.addi %71, %arg1 : i32
    %c1024_i32 = arith.constant 1024 : i32
    %73 = arith.muli %72, %c1024_i32 : i32
    %c1024_i32_27 = arith.constant 1024 : i32
    %74 = arith.addi %73, %c1024_i32_27 : i32
    %75 = arith.cmpi sle, %74, %70 : i32
    %76 = arith.extui %75 : i1 to i32
    %c0_i32_28 = arith.constant 0 : i32
    %77 = arith.cmpi ne, %76, %c0_i32_28 : i32
    scf.if %77 {
      %c0_30 = arith.constant 0 : index
      %c0_31 = arith.constant 0 : index
      %81 = vector.load %arg5[%c0_30, %c0_31] : memref<8x128xf32, #tpu.memory_space<vmem>>, vector<8x128xf32>
      %82 = vector.shape_cast %69 : vector<8x128xf32> to vector<1x8x128xf32>
      %cst_32 = arith.constant dense<0.000000e+00> : vector<8x128xf32>
      %83 = vector.multi_reduction <add>, %82, %cst_32 [0] : vector<1x8x128xf32> to vector<8x128xf32>
      %84 = arith.addf %81, %83 : vector<8x128xf32>
      %c0_33 = arith.constant 0 : index
      %c0_34 = arith.constant 0 : index
      %85 = vector.load %arg5[%c0_33, %c0_34] : memref<8x128xf32, #tpu.memory_space<vmem>>, vector<8x128xf32>
      tpu.vector_store %arg5[%c0_33, %c0_34], %84 {strides = array<i32>} : memref<8x128xf32, #tpu.memory_space<vmem>>, vector<8x128xf32>,
    } else {
    }
    %78 = arith.cmpi sgt, %74, %70 : i32
    %79 = arith.extui %78 : i1 to i32
    %c0_i32_29 = arith.constant 0 : i32
    %80 = arith.cmpi ne, %79, %c0_i32_29 : i32
    scf.if %80 {
      %81 = tpu.iota {dimensions = array<i32: 0>} : vector<8x128xi32>
      %82 = tpu.iota {dimensions = array<i32: 1>} : vector<8x128xi32>
      %c128_i32 = arith.constant 128 : i32
      %83 = vector.broadcast %c128_i32 : i32 to vector<8x128xi32>
      %84 = arith.muli %81, %83 : vector<8x128xi32>
      %85 = vector.broadcast %73 : i32 to vector<8x128xi32>
      %86 = arith.addi %85, %84 : vector<8x128xi32>
      %87 = arith.addi %86, %82 : vector<8x128xi32>
      %88 = vector.broadcast %70 : i32 to vector<8x128xi32>
      %89 = arith.cmpi slt, %87, %88 : vector<8x128xi32>
      %cst_30 = arith.constant 0.000000e+00 : f32
      %90 = vector.broadcast %cst_30 : f32 to vector<8x128xf32>
      %91 = arith.select %89, %69, %90 : vector<8x128xi1>, vector<8x128xf32>
      %c0_31 = arith.constant 0 : index
      %c0_32 = arith.constant 0 : index
      %92 = vector.load %arg5[%c0_31, %c0_32] : memref<8x128xf32, #tpu.memory_space<vmem>>, vector<8x128xf32>
      %93 = vector.shape_cast %91 : vector<8x128xf32> to vector<1x8x128xf32>
      %cst_33 = arith.constant dense<0.000000e+00> : vector<8x128xf32>
      %94 = vector.multi_reduction <add>, %93, %cst_33 [0] : vector<1x8x128xf32> to vector<8x128xf32>
      %95 = arith.addf %92, %94 : vector<8x128xf32>
      %c0_34 = arith.constant 0 : index
      %c0_35 = arith.constant 0 : index
      %96 = vector.load %arg5[%c0_34, %c0_35] : memref<8x128xf32, #tpu.memory_space<vmem>>, vector<8x128xf32>
      tpu.vector_store %arg5[%c0_34, %c0_35], %95 {strides = array<i32>} : memref<8x128xf32, #tpu.memory_space<vmem>>, vector<8x128xf32>,
    } else {
    }
    return
  }
  func.func @transform_0(%arg0: i32, %arg1: i32, %arg2: memref<1xi32, #tpu.memory_space<smem>>) -> (i32, i32, i32) {
    %c1_i32 = arith.constant 1 : i32
    %0 = arith.muli %arg0, %c1_i32 : i32
    %1 = arith.addi %0, %arg1 : i32
    %c0_i32 = arith.constant 0 : i32
    %c0_i32_0 = arith.constant 0 : i32
    %c0_i32_1 = arith.constant 0 : i32
    return %c0_i32, %1, %c0_i32_0 : i32, i32, i32
  }
  func.func @transform_1(%arg0: i32, %arg1: i32, %arg2: memref<1xi32, #tpu.memory_space<smem>>) -> (i32, i32, i32) {
    %c1_i32 = arith.constant 1 : i32
    %0 = arith.muli %arg0, %c1_i32 : i32
    %1 = arith.addi %0, %arg1 : i32
    %c0_i32 = arith.constant 0 : i32
    %c0_i32_0 = arith.constant 0 : i32
    %c0_i32_1 = arith.constant 0 : i32
    return %c0_i32, %1, %c0_i32_0 : i32, i32, i32
  }
  func.func @transform_2(%arg0: i32, %arg1: i32, %arg2: memref<1xi32, #tpu.memory_space<smem>>) -> (i32, i32) {
    %c0_i32 = arith.constant 0 : i32
    %c0_i32_0 = arith.constant 0 : i32
    return %arg0, %c0_i32 : i32, i32
  }
}

</mosaic_0001>

<bundles_post_ra>
// kernel: tpu_custom_call.1
= control target key start
LH: loop header
LB: loop body
LE: loop exit
PB: predicated region body
PF: predicated region fallthrough
CT: control target
= control target key end

     0   :  { %s895_s0 = inlined_call_operand.<no memory space> [shape: s32[1], index: 0, kind: input, shape index: {}]   ;;  %s896_s1 = inlined_call_operand.hbm [shape: f32[4,16,128], index: 1, kind: input, shape index: {}]   ;;  %s897_s2 = inlined_call_operand.hbm [shape: f32[4,16,128], index: 2, kind: input, shape index: {}]   ;;  %s898_s3 = inlined_call_operand.hbm [shape: f32[16,128], index: 3, kind: output, shape index: {}]  }
   0x1   :  { %899 = sst [smem:[#allocation13_spill]] %s896_s1 }
   0x2   :  { %8 = sst [smem:[#allocation3]] %s895_s0 }
   0x3   :  { %9 = vsyncpa [#allocation5], 0 }
   0x4   :  { %11 = vsyncpa [#allocation5 + $0x1], 0 }
   0x5   :  { %12 = vsyncpa [#allocation8], 0 }
   0x6   :  { %14 = vsyncpa [#allocation8 + $0x1], 0 }
   0x7   :  { %15 = vsyncpa [#allocation6], 0 }
   0x8   :  { %17 = vsyncpa [#allocation6 + $0x1], 0  ;;  %s705_s14 = smov 0   ;;  %s707_s15 = smov 0  }
   0x9   :  { %s709_s16 = smov 0   ;;  %s711_s17 = smov 0  }
   0xa   :  { %s713_s18 = smov 0   ;;  %s715_s19 = smov 0  }
   0xb LB: > { %s435_s0 = sadd.s32 4294967295, %s673_s19   ;;  %s436_s20 = sadd.s32 4294967294, %s673_s19   ;;  %s673_s19 = sphi %s715_s19, %s23_s19   ;;  %s669_s18 = sphi %s713_s18, %s912_s18   ;;  %s665_s17 = sphi %s711_s17, %s911_s17   ;;  %s661_s16 = sphi %s709_s16, %s910_s16   ;;  %s657_s15 = sphi %s707_s15, %s909_s15   ;;  %s653_s14 = sphi %s705_s14, %s908_s14  }
   0xc   : > { %s35_s21 = sadd.s32 1, %s669_s18  ;;  %s44_s22 = sadd.s32 1, %s661_s16 }
   0xd   : > { %p37_p0 = scmp.ge.s32.totalorder %s35_s21, 2  ;;  %p51_p1 = scmp.ne.s32.totalorder %s661_s16, %s657_s15 }
   0xe   : > { %p52_p2 = scmp.eq.s32.totalorder %s673_s19, 0  ;;  %p57_p3 = scmp.ne.s32.totalorder %s657_s15, %s653_s14 }
   0xf   : > { %s914_s21 = smov (%p37_p0, %s35_s21), 0  ;;  %p58_p5 = scmp.eq.s32.totalorder %s435_s0, 0 }
  0x10   : > { %p746_p4 = por %p52_p2, %p51_p1  ;;  %s41_s24 = ssub.s32 %s669_s18, %s914_s21 }
  0x11   : > { %p109_p6 = scmp.eq.s32.totalorder %s435_s0, 1  ;;  %p42_p7 = scmp.eq.s32.totalorder %s41_s24, 0 }
  0x12   : > { %p752_p8 = por %p58_p5, %p57_p3  ;;  %p115_p10 = scmp.eq.s32.totalorder %s436_s20, 1 }
  0x13   : > { %p756_p9 = por %p109_p6, %p51_p1  ;;  %p477_p13 = scmp.lt.s32.totalorder %s673_s19, 2 }
  0x14   : > { %s761_s27 = scalar_select %p42_p7, %s661_s16, %s44_s22  }
  0x15   : > { %p763_p11 = por %p115_p10, %p57_p3  ;;  %s770_s29 = sand.u32 1, %s661_s16  }
  0x16   : > { %s439_s30 = sshll.u32 %s770_s29, 5  ;;  %s440_s4 = sshll.u32 %s669_s18, 7 }
  0x17   : > { %s904_s1 = sld [smem:[#allocation13_spill]]  ;;  %s139_s8 = scalar_lea.vmem [#allocation4], %s439_s30 }
  0x18   : > { %s146_s9 = sshll.u32 %s139_s8, 4  ;;  %p783_p0 = pnand %p477_p13, %p746_p4  ;;  %s147_s9 = int_to_ptr.vmem [resolvable:$true] %s146_s9 }
  0x19   : > { %s136_s11 = scalar_lea.sflag [#allocation5], %s770_s29  ;;  %s546_s12 = scalar_lea.vmem %s147_s9, 512 }
  0x1a   : > { %p535_p1 = pneg %p783_p0  ;;  %p547_p2 = scmp.ne.s32.totalorder %s147_s9, %s546_s12 }
  0x1b   : > { %s675_s13 = smov [#allocation4]  }
  0x1c   : > { %p549_p3 = pnand %p547_p2, %p535_p1  ;;  %s551_s0 = sshll.u32 %s675_s13, 4  ;;  %s552_s0 = int_to_ptr.vmem [resolvable:$false] %s551_s0 }
  0x1d   : > { %s145_s7 = scalar_lea.hbm %s904_s1, %s440_s4  ;;  %s553_s20 = scalar_lea.vmem %s552_s0, 1024 }
  0x1e   : > { %p550_p5 = pneg %p549_p3  ;;  %p554_p6 = scmp.lt.s32.totalorder %s147_s9, %s552_s0 }
  0x1f   : > { %p555_p4 = scmp.lt.s32.totalorder %s553_s20, %s546_s12 }
  0x21   : > { %p556_p7 = por %p555_p4, %p554_p6 }
  0x23   : > { %p557_p10 = pnand %p556_p7, %p550_p5 }
  0x25   : > { %560 = shalt.err (!%p557_p10)
}
  0x26   : > { %s676_s22 = smov 256   ;;  %s677_s23 = smov 128  }
  0x27   : > { %s678_s24 = smov 8   ;;  %p443_p13 = scmp.ge.s32.totalorder %s673_s19, 1 }
  0x28   : > { %469 = dma.hbm_to_vmem [thread:$0]  (!%p783_p0), %s145_s7, 512, %s147_s9, %s136_s11, %s676_s22, %s677_s23, %s678_s24  }
  0x29   : > { %p175_p2 = scmp.lt.s32.totalorder %s673_s19, 3  ;;  %s166_s12 = scalar_lea.hbm %s897_s2, %s440_s4 }
  0x2a   : > { %s160_s13 = scalar_lea.vmem [#allocation7], %s439_s30  ;;  %s157_s20 = scalar_lea.sflag [#allocation8], %s770_s29 }
  0x2b   : > { %p798_p3 = pnand %p443_p13, %p175_p2  ;;  %s167_s0 = sshll.u32 %s160_s13, 4  ;;  %s168_s0 = int_to_ptr.vmem [resolvable:$true] %s167_s0 }
  0x2c   : > { %s574_s1 = scalar_lea.vmem %s168_s0, 512  ;;  %s679_s7 = smov [#allocation7]  }
  0x2d   : > { %p575_p5 = scmp.ne.s32.totalorder %s168_s0, %s574_s1  ;;  %s579_s9 = sshll.u32 %s679_s7, 4  ;;  %s580_s9 = int_to_ptr.vmem [resolvable:$false] %s579_s9 }
  0x2e   : > { %s581_s11 = scalar_lea.vmem %s580_s9, 1024  ;;  %p582_p7 = scmp.lt.s32.totalorder %s168_s0, %s580_s9 }
  0x2f   : > { %p577_p6 = pnand %p575_p5, %p535_p1  ;;  %p583_p10 = scmp.lt.s32.totalorder %s581_s11, %s574_s1 }
  0x31   : > { %p578_p4 = pneg %p577_p6  ;;  %p584_p13 = por %p583_p10, %p582_p7 }
  0x33   : > { %p585_p2 = pnand %p584_p13, %p578_p4 }
  0x35   : > { %588 = shalt.err (!%p585_p2)
}
  0x36   : > { %472 = dma.hbm_to_vmem [thread:$0]  (!%p783_p0), %s166_s12, 512, %s168_s0, %s157_s20, %s676_s22, %s677_s23, %s678_s24  }
  0x37   : > { %179 = sbr.rel (%p798_p3) target bundleno = 147 (0x93), region = 28  ;;  %s819_s29 = sand.u32 (!%p798_p3), 1, %s657_s15  }
  0x38   : > { %s444_s30 = sshll.u32 (!%p798_p3), %s819_s29, 5  ;;  %s182_s4 = scalar_lea.sflag (!%p798_p3), [#allocation5], %s819_s29 }
  0x39   : > { %s185_s6 = scalar_lea.vmem (!%p798_p3), [#allocation4], %s444_s30 }
  0x3c   : > { %640 = dma.done.wait (%p752_p8), %s182_s4, 512  }
  0x3d   : > { %642 = vsyncadd (%p752_p8), %s182_s4, 4294966784  ;;  %s191_s1 = scalar_lea.sflag [#allocation8], %s819_s29  ;;  %s194_s10 = scalar_lea.vmem [#allocation7], %s444_s30 }
  0x3e   : > { %644 = dma.done.wait (%p752_p8), %s191_s1, 512  }
  0x3f   : > { %646 = vsyncadd (%p752_p8), %s191_s1, 4294966784  ;;  %s446_s22 = sshll.u32 %s819_s29, 3  ;;  %s453_s23 = sshll.u32 %s665_s17, 10  ;;  %v680_v0 = vmov 0.0   ;;  %v227_v1 = vld [vmem:[%s185_s6] sm:$0xff]  ;;  %v447_v2 = vld [vmem:[%s185_s6 + $0x8] sm:$0xff] }
  0x40   : > { %s834_s24 = sld [smem:[#allocation3]]  ;;  %s836_s5 = scalar_lea.vmem [#allocation9], %s446_s22  ;;  %v448_v3 = vld [vmem:[%s185_s6 + $0x10] sm:$0xff]  ;;  %v449_v4 = vld [vmem:[%s185_s6 + $0x18] sm:$0xff]  ;;  %v234_v5 = vld [vmem:[%s194_s10] sm:$0xff] }
  0x41   : > { %226 = vst [vmem:[%s836_s5] sm:$0xff] %v680_v0  ;;  %s841_s8 = sadd.s32 1024, %s453_s23  ;;  %v450_v6 = vld [vmem:[%s194_s10 + $0x8] sm:$0xff]  ;;  %v241_v7 = vadd.f32 %v448_v3, %v227_v1  ;;  %v451_v8 = vld [vmem:[%s194_s10 + $0x10] sm:$0xff]  ;;  %v452_v9 = vld [vmem:[%s194_s10 + $0x18] sm:$0xff]  ;;  %v245_v10 = vadd.f32 %v449_v4, %v447_v2  ;;  %v253_v11 = vmin.f32 %v234_v5, %v227_v1  ;;  %v262_v13 = vmax.f32 %v234_v5, %v227_v1 }
  0x42   : > { %v256_v12 = vmin.f32 %v450_v6, %v447_v2  ;;  %v252_v14 = vmax.f32 %v451_v8, %v448_v3  ;;  %v255_v15 = vmax.f32 %v452_v9, %v449_v4  ;;  %v261_v16 = vmin.f32 %v451_v8, %v448_v3 }
  0x43   : > { %v265_v17 = vmin.f32 %v452_v9, %v449_v4  ;;  %v266_v18 = vmax.f32 %v450_v6, %v447_v2  ;;  %v270_v19 = vsub.f32 %v451_v8, %v234_v5  ;;  %v273_v20 = vsub.f32 %v448_v3, %v227_v1 }
  0x44   : > { %v242_v21 = vsub.f32 %v241_v7, %v234_v5  ;;  %v254_v22 = vsub.f32 %v252_v14, %v253_v11  ;;  %v257_v23 = vsub.f32 %v255_v15, %v256_v12  ;;  %v263_v24 = vsub.f32 %v261_v16, %v262_v13 }
  0x45   : > { %v246_v25 = vsub.f32 %v245_v10, %v450_v6  ;;  %v267_v26 = vsub.f32 %v265_v17, %v266_v18  ;;  %v271_v27 = vsub.f32 %v452_v9, %v450_v6  ;;  %v274_v28 = vsub.f32 %v449_v4, %v447_v2 }
  0x46   : > { %v258_v29 = vmul.f32 %v254_v22, %v254_v22  ;;  %v259_v30 = vmul.f32 %v257_v23, %v257_v23  ;;  %v264_v31 = vmax.f32 %v263_v24, 0.0  ;;  %v243_v35 = vsub.f32 %v242_v21, %v451_v8  ;;  %p454_p8 = scmp.gt.s32.totalorder %s841_s8, %s834_s24 }
  0x47   : > { %v268_v32 = vmax.f32 %v267_v26, 0.0  ;;  %v272_v33 = vmul.f32 %v271_v27, %v270_v19  ;;  %v275_v34 = vmul.f32 %v274_v28, %v273_v20  ;;  %v247_v36 = vsub.f32 %v246_v25, %v452_v9 }
  0x48   : > { %v260_v37 = vadd.f32 %v259_v30, %v258_v29  ;;  %v244_v41 = vmul.f32 0.5, %v243_v35 }
  0x49   : > { %v269_v38 = vmul.f32 %v268_v32, %v264_v31  ;;  %v276_v39 = vadd.f32 %v275_v34, %v272_v33  ;;  %v248_v42 = vmul.f32 0.5, %v247_v36 }
  0x4a   : > { %v249_v44 = vmul.f32 %v244_v41, %v244_v41 }
  0x4b   : > { %v277_v40 = vsub.f32 %v276_v39, %v269_v38  ;;  %v250_v45 = vmul.f32 %v248_v42, %v248_v42  ;;  %v281_v47 = vmul.f32 %v269_v38, %v260_v37 }
  0x4d   : > { %v278_v43 = vmul.f32 %v277_v40, %v260_v37  ;;  %v251_v46 = vadd.f32 %v250_v45, %v249_v44 }
  0x4f   : > { %531 = vrcp.f32 %v278_v43  ;;  %v284_v48 = vmul.f32 %v277_v40, %v251_v46 }
  0x5c   : > { %v532_v49 = vpop.eup %531 }
  0x5d   : > { %v282_v50 = vmul.f32 %v532_v49, %v281_v47  ;;  %v285_v51 = vmul.f32 %v532_v49, %v284_v48  ;;  %294 = sbr.rel (%p454_p8) target bundleno = 102 (0x66), region = 44 }
  0x5f   : > { %v283_v52 = vsub.f32 1.0, %v282_v50 }
  0x61   : > { %v286_v53 = vadd.f32 %v285_v51, %v283_v52 }
  0x62   : > { %v295_v54 = vld [vmem:[%s836_s5] sm:$0xff] }
  0x63   : > { %v297_v55 = vadd.f32 %v295_v54, %v286_v53 }
  0x65   : > { %298 = vst [vmem:[%s836_s5] sm:$0xff] %v297_v55 }
  0x66 PF: > { %p455_p0 = scmp.le.s32.totalorder %s841_s8, %s834_s24 }
  0x68   : > { %302 = sbr.rel (%p455_p0) target bundleno = 124 (0x7c), region = 48 }
  0x6d   : > { %v303_v56 = vlaneseq  ;;  %v308_v58 = vstv %s453_s23  ;;  %v311_v62 = vstv %s834_s24  ;;  %v314_v0 = vld [vmem:[%s836_s5] sm:$0xff] }
  0x6f   : > { %v304_v57 = vshrl.u32 %v303_v56, 7  ;;  %v306_v59 = vand.u32 127, %v303_v56 }
  0x71   : > { %v307_v60 = vmul.u32 128, %v304_v57 }
  0x73   : > { %v309_v61 = vadd.s32 %v308_v58, %v307_v60 }
  0x75   : > { %v310_v63 = vadd.s32 %v309_v61, %v306_v59 }
  0x77   : > { %vm312_vm0 = vcmp.lt.s32.totalorder %v310_v63, %v311_v62 }
  0x78   : > { %v313_v1 = vsel %vm312_vm0, %v286_v53, 0.0 }
  0x79   : > { %v316_v2 = vadd.f32 %v314_v0, %v313_v1 }
  0x7b   : > { %317 = vst [vmem:[%s836_s5] sm:$0xff] %v316_v2 }
  0x7c PF: > { %s457_s25 = sshll.u32 %s665_s17, 7  ;;  %s332_s20 = sshll.u32 %s836_s5, 4  ;;  %s333_s20 = int_to_ptr.vmem [resolvable:$true] %s332_s20 }
  0x7d   : > { %s330_s0 = scalar_lea.hbm %s898_s3, %s457_s25  ;;  %s319_s7 = scalar_lea.sflag [#allocation6], %s819_s29 }
  0x7e   : > { %s589_s9 = scalar_lea.vmem %s333_s20, 128  ;;  %s681_s11 = smov [#allocation9]  }
  0x7f   : > { %p590_p1 = scmp.ne.s32.totalorder %s333_s20, %s589_s9  ;;  %s593_s30 = sshll.u32 %s681_s11, 4  ;;  %s594_s30 = int_to_ptr.vmem [resolvable:$false] %s593_s30 }
  0x80   : > { %s595_s4 = scalar_lea.vmem %s594_s30, 256  ;;  %p596_p6 = scmp.lt.s32.totalorder %s333_s20, %s594_s30 }
  0x81   : > { %p591_p3 = pnand %p590_p1, %p756_p9  ;;  %p597_p4 = scmp.lt.s32.totalorder %s595_s4, %s589_s9 }
  0x83   : > { %p592_p5 = pneg %p591_p3  ;;  %p598_p7 = por %p597_p4, %p596_p6 }
  0x85   : > { %p599_p10 = pnand %p598_p7, %p592_p5 }
  0x87   : > { %602 = shalt.err (!%p599_p10)
}
  0x88   : > { %s603_s17 = scalar_lea.hbm %s330_s0, 128  ;;  %s607_s1 = scalar_lea.hbm %s898_s3, 256 }
  0x89   : > { %p604_p13 = scmp.ne.s32.totalorder %s330_s0, %s603_s17  ;;  %p608_p0 = scmp.lt.s32.totalorder %s330_s0, %s898_s3 }
  0x8a   : > { %p609_p1 = scmp.lt.s32.totalorder %s607_s1, %s603_s17 }
  0x8b   : > { %p605_p2 = pnand %p604_p13, %p756_p9 }
  0x8c   : > { %p610_p3 = por %p609_p1, %p608_p0 }
  0x8d   : > { %p606_p8 = pneg %p605_p2 }
  0x8f   : > { %p611_p12 = pnand %p610_p3, %p606_p8 }
  0x91   : > { %614 = shalt.err (!%p611_p12)
}
  0x92   : > { %464 = dma.vmem_to_hbm [thread:$0]  (%p756_p9), %s333_s20, 128, %s330_s0, %s319_s7  }
  0x93 PF: > { %s344_s23 = sand.u32 1, %s653_s14   ;;  %p907_p5 = scmp.ge.s32.totalorder %s673_s19, 2 }
  0x94   : > { %s345_s24 = scalar_lea.sflag [#allocation6], %s344_s23 }
  0x95   : > { %p474_p6 = pnand %p907_p5, %p763_p11 }
  0x97   : > { %p475_p4 = pneg %p474_p6 }
  0x99   : > { %648 = dma.done.wait (%p475_p4), %s345_s24, 128  }
  0x9a   : > { %650 = vsyncadd (%p475_p4), %s345_s24, 4294967168  ;;  %s23_s19 = sadd.s32 1, %s673_s19   ;;  %s908_s14 = smov %s657_s15 }
  0x9b   : > { %p20_p7 = scmp.ge.s32.totalorder %s23_s19, 4   ;;  %s909_s15 = smov %s661_s16 }
  0x9c   : > { %s910_s16 = smov %s761_s27  ;;  %s911_s17 = smov %s669_s18 }
  0x9d   : > { %s912_s18 = smov %s914_s21  ;;  %22 = sbr.rel (!%p20_p7) target bundleno = 11 (0xb), region = 104 }
  0xa2   :  { %350 = vsyncpa [#allocation5], 1 }
  0xa3   :  { %352 = vsyncpa [#allocation5 + $0x1], 1 }
  0xa4   :  { %353 = vsyncpa [#allocation8], 1 }
  0xa5   :  { %355 = vsyncpa [#allocation8 + $0x1], 1 }
  0xa6   :  { %356 = vsyncpa [#allocation6], 1 }
  0xa7   :  { %358 = vsyncpa [#allocation6 + $0x1], 1 }

</bundles_post_ra>
